<compile_context>
chip_gen: v7x
topology: tpu7x:2x2x1
jax: 0.10.0
libtpu: 0.0.40
codegen_flags: <defaults>
</compile_context>

<pallas_src>
import functools
import math

import numpy as np
import jax
import jax.numpy as jnp
from jax import lax
from jax.experimental import pallas as pl
from jax.experimental.pallas import tpu as pltpu

# ----------------------- model configuration (synthetic) -----------------------
IN_CH = 3
IMG = 16
NUM_PER_BLOCK = [2, 2]          # self.num_per_block
CHANNELS = [8, 16]              # per-layer output channels
STRIDES = [1, 2]                # stride of block 0 of each layer
RETURN_LAYERS = ["1"]           # task_cfg['return_layers']
NUM_CLASSES = 10
BN_EPS = 1e-5
N_BATCH = 16                    # batch of images
B_TILE = 8                      # images packed per program -> grid = N_BATCH / B_TILE = 2

H0 = W0 = IMG                   # stem / layer-0 spatial size
H1 = W1 = IMG // 2              # layer-1 spatial size
C0, C1 = CHANNELS
HP0 = H0 + 2                    # slab rows per image (zero guard row top & bottom)
HP1 = H1 + 2
LANES = 128                     # W0*C0 = W1*C1 = 128 (input lanes W0*IN_CH=48, zero-padded)
K3 = 3 * LANES                  # K of one fused 3-tap conv GEMM

assert NUM_PER_BLOCK == [2, 2] and CHANNELS == [8, 16] and STRIDES == [1, 2]
assert B_TILE % 4 == 0          # keeps B_TILE*HP0 / B_TILE*HP1 multiples of 8 sublanes


# ------------------------------ parameter init ---------------------------------
def _kaiming(key, shape, fan_in):
    # kaiming_normal_(a=0.01, mode='fan_in', nonlinearity='leaky_relu')
    std = math.sqrt(2.0 / ((1.0 + 0.01 ** 2) * fan_in))
    return jax.random.normal(key, shape, jnp.float32) * std


def init_raw_params(key):
    """Conv weights in HWIO layout (kh, kw, cin, cout); synthetic BN stats
    (gamma=1, beta=0, mean=0, var=1) are folded at prepare time."""
    ks = iter(jax.random.split(key, 16))
    p = {"stem_w": _kaiming(next(ks), (3, 3, IN_CH, C0), 3 * 3 * IN_CH)}
    blocks = []
    in_ch = C0
    for li, nb in enumerate(NUM_PER_BLOCK):
        out_ch = CHANNELS[li]
        layer = []
        for bi in range(nb):
            cin = in_ch if bi == 0 else out_ch
            w1 = _kaiming(next(ks), (3, 3, cin, out_ch), 9 * cin)
            w2 = _kaiming(next(ks), (3, 3, out_ch, out_ch), 9 * out_ch)
            layer.append((w1, w2))
        blocks.append(layer)
        in_ch = out_ch
    p["blocks"] = blocks
    p["ds1_w"] = _kaiming(next(ks), (1, 1, C0, C1), C0)     # 1x1 stride-2 downsample
    p["head_w"] = _kaiming(next(ks), (C1, NUM_CLASSES), C1)
    p["head_b"] = jnp.zeros((NUM_CLASSES,), jnp.float32)
    return p


def _fold_bn(w_hwio):
    """Fold inference BN (general per-channel form; synthetic stats here)."""
    w = np.asarray(w_hwio, np.float32)
    cout = w.shape[-1]
    gamma, beta = np.ones(cout, np.float32), np.zeros(cout, np.float32)
    mean, var = np.zeros(cout, np.float32), np.ones(cout, np.float32)
    scale = gamma / np.sqrt(var + BN_EPS)
    return w * scale[None, None, None, :], beta - mean * scale


def _band(w_hwio, w_in, stride, pad):
    """Per-kh-tap banded weight: (K, w_in*cin, w_out*cout).
    out[r, wo*cout+co] = sum_kh sum_{wi,ci} in[r+kh-pad, wi*cin+ci] * band[kh, wi*cin+ci, ...]
    i.e. the kw taps, W stride and W zero-padding of the conv are folded into the band."""
    K, _, cin, cout = w_hwio.shape
    w_out = (w_in + 2 * pad - K) // stride + 1
    band = np.zeros((K, w_in * cin, w_out * cout), np.float32)
    for kh in range(K):
        for kw in range(K):
            for wo in range(w_out):
                wi = wo * stride + kw - pad
                if 0 <= wi < w_in:
                    band[kh, wi * cin:(wi + 1) * cin, wo * cout:(wo + 1) * cout] = w_hwio[kh, kw]
    return band


def _fused_band(w_hwio, w_in, stride):
    """3x3 conv -> K-stacked banded weight (3*LANES, LANES), lane-padded per tap."""
    band = _band(w_hwio, w_in, stride, 1)                  # (3, w_in*cin, w_out*cout)
    if band.shape[1] < LANES:
        band = np.pad(band, ((0, 0), (0, LANES - band.shape[1]), (0, 0)))
    assert band.shape == (3, LANES, LANES)
    return band.reshape(K3, LANES)


def _probe_roll_down_shift():
    """Return the pltpu.roll shift s (+1 or -1) such that roll(x, s, axis=0)[r] == x[r-1]."""
    def k(x_ref, o_ref):
        o_ref[...] = pltpu.roll(x_ref[...], 1, axis=0)
    x = jnp.arange(8 * 128, dtype=jnp.float32).reshape(8, 128)
    y = np.asarray(jax.block_until_ready(
        pl.pallas_call(k, out_shape=jax.ShapeDtypeStruct((8, 128), jnp.float32))(x)))
    if np.array_equal(y, np.roll(np.asarray(x), 1, axis=0)):
        return 1
    assert np.array_equal(y, np.roll(np.asarray(x), -1, axis=0)), "unexpected pltpu.roll semantics"
    return -1


def prepare_kernel_params(raw, b_tile=B_TILE):
    """Build the banded / block-diagonal / lane-dense operands consumed by the kernel."""
    kp = {"b_tile": b_tile, "dn_shift": _probe_roll_down_shift()}

    conv_w, conv_b = [], []

    def add_conv(w_hwio, w_in, stride, w_out):
        wf, bf_ = _fold_bn(w_hwio)
        conv_w.append(_fused_band(wf, w_in, stride))
        conv_b.append(np.tile(bf_, w_out))

    add_conv(raw["stem_w"], W0, 1, W0)                      # 0: stem (lane-padded 48 -> 128)
    for bi in range(2):                                      # 1..4: layer 0 convs
        for w in raw["blocks"][0][bi]:
            add_conv(w, W0, 1, W0)
    w1, w2 = raw["blocks"][1][0]
    add_conv(w1, W0, 2, W1)                                  # 5: layer-1 b0 conv1 (W stride 2)
    add_conv(w2, W1, 1, W1)                                  # 6: layer-1 b0 conv2
    for w in raw["blocks"][1][1]:                            # 7,8: layer-1 b1 conv1/conv2
        add_conv(w, W1, 1, W1)
    kp["conv_w"] = jnp.asarray(np.stack(conv_w), jnp.bfloat16)      # (9, 384, 128)
    kp["conv_b"] = jnp.asarray(np.stack(conv_b), jnp.float32)       # (9, 128)

    dsf, dsb = _fold_bn(raw["ds1_w"])
    kp["ds_w"] = jnp.asarray(_band(dsf, W0, 2, 0)[0], jnp.bfloat16)   # (128, 128)
    kp["ds_b"] = jnp.asarray(np.tile(dsb, W1)[None, :], jnp.float32)  # (1, 128)

    # Block-diagonal H-subsample (stride 2): out row i*HP1+1+ho <- in row i*HP0+1+2*ho.
    sel = np.zeros((b_tile * HP1, b_tile * HP0), np.float32)
    for i in range(b_tile):
        for ho in range(H1):
            sel[i * HP1 + 1 + ho, i * HP0 + 1 + 2 * ho] = 1.0
    kp["sel"] = jnp.asarray(sel)

    # Per-image interior-row summation (global-average-pool numerator).
    usum = np.zeros((b_tile, b_tile * HP1), np.float32)
    for i in range(b_tile):
        usum[i, i * HP1 + 1:i * HP1 + 1 + H1] = 1.0
    kp["usum"] = jnp.asarray(usum)

    # Head: GAP + Linear as one lane matmul, classes padded to 128 (lane-dense store).
    hw = np.asarray(raw["head_w"], np.float32) / float(H1 * W1)       # (C1, classes)
    head_p = np.zeros((LANES, LANES), np.float32)
    head_p[:, :NUM_CLASSES] = np.tile(hw, (W1, 1))                    # lane w*C1+c -> head_w[c]
    kp["head_p"] = jnp.asarray(head_p)
    head_b = np.zeros((1, LANES), np.float32)
    head_b[0, :NUM_CLASSES] = np.asarray(raw["head_b"], np.float32)
    kp["head_b"] = jnp.asarray(head_b)

    # Interior-row masks: keep guard rows exactly zero after every conv so the
    # rolled kh taps never bleed across image boundaries.
    m0 = np.zeros((b_tile * HP0, LANES), np.float32)
    m1 = np.zeros((b_tile * HP1, LANES), np.float32)
    for i in range(b_tile):
        m0[i * HP0 + 1:i * HP0 + 1 + H0, :] = 1.0
        m1[i * HP1 + 1:i * HP1 + 1 + H1, :] = 1.0
    kp["m0"] = jnp.asarray(m0)
    kp["m1"] = jnp.asarray(m1)
    return kp


# ------------------------------ fused Pallas kernel -----------------------------
def _network_kernel(x_ref, conv_w_ref, conv_b_ref, ds_w_ref, ds_b_ref,
                    sel_ref, usum_ref, head_p_ref, head_b_ref, m0_ref, m1_ref,
                    o_ref, *, dn_shift):
    f32, bf16 = jnp.float32, jnp.bfloat16
    relu = lambda t: jnp.maximum(t, 0.0)

    def make_lhs(a):
        """Fused 3-tap conv LHS: [row r-1 | row r | row r+1] along lanes, one bf16 cast.
        Rolls run on the XLU; wrap-around rows land on zero guard rows so they are exact."""
        m = a.shape[0]
        s_dn = 1 if dn_shift == 1 else m - 1          # shift realizing out[r] = in[r-1]
        dn = pltpu.roll(a, s_dn, axis=0)
        up = pltpu.roll(a, m - s_dn, axis=0)          # out[r] = in[r+1]
        return jnp.concatenate([dn, a, up], axis=1).astype(bf16)

    def band_dot(lhs, idx):
        """One K=384 bf16 MXU GEMM == a full 3x3 conv (kw taps / W stride / W pad are in
        the banded weight, kh taps in the K axis), f32 accumulation + folded-BN bias."""
        return jnp.dot(lhs, conv_w_ref[idx],
                       preferred_element_type=f32) + conv_b_ref[idx:idx + 1, :]

    # ---- stem: conv3x3 + folded BN + ReLU ----
    x = x_ref[0]                                       # (B_TILE*HP0, 128): guard rows & pad lanes zero
    feat = relu(band_dot(make_lhs(x), 0)) * m0_ref[...]

    # ---- layer 0: two residual blocks, stride 1 ----
    for b in range(2):
        identity = feat
        h = relu(band_dot(make_lhs(feat), 1 + 2 * b)) * m0_ref[...]
        y = band_dot(make_lhs(h), 2 + 2 * b)
        feat = relu(y + identity) * m0_ref[...]

    # ---- layer 1, block 0: stride-2 conv1 and 1x1 stride-2 downsample share one lhs ----
    lhs = make_lhs(feat)
    h_full = band_dot(lhs, 5)                                              # W already strided
    ds_full = jnp.dot(lhs[:, LANES:2 * LANES], ds_w_ref[...],
                      preferred_element_type=f32) + ds_b_ref[...]          # 1x1 conv: center tap
    both = jnp.dot(sel_ref[...], jnp.concatenate([h_full, ds_full], axis=1),
                   preferred_element_type=f32)                             # H subsample (block-diag)
    h = relu(both[:, :LANES])                          # sel guard rows are zero -> no mask needed
    identity = both[:, LANES:]
    y = band_dot(make_lhs(h), 6)
    feat = relu(y + identity) * m1_ref[...]

    # ---- layer 1, block 1 ----
    identity = feat
    h = relu(band_dot(make_lhs(feat), 7)) * m1_ref[...]
    y = band_dot(make_lhs(h), 8)
    feat = relu(y + identity) * m1_ref[...]

    # ---- head: global average pool + linear (lane-dense, classes padded to 128) ----
    pooled = jnp.dot(usum_ref[...], feat, preferred_element_type=f32)      # (B_TILE, 128)
    o_ref[0] = jnp.dot(pooled, head_p_ref[...],
                       preferred_element_type=f32) + head_b_ref[...]


def single_task_network_forward(kparams, images_nchw):
    """Eval-mode forward of SingleTaskNetwork (task='clf') -> dict(outputs=logits)."""
    kp = kparams
    b_tile = kp["b_tile"]
    n = images_nchw.shape[0]
    n_pad = pl.cdiv(n, b_tile) * b_tile
    num_tiles = n_pad // b_tile

    # NCHW -> lane-dense slab: (num_tiles, B_TILE*(H+2), 128); one zero guard row above
    # and below every image, lanes = W*C (48 real input lanes zero-padded to 128).
    x = jnp.transpose(images_nchw, (0, 2, 3, 1)).reshape(n, H0, W0 * IN_CH)
    x = jnp.pad(x, ((0, n_pad - n), (1, 1), (0, LANES - W0 * IN_CH)))
    x = x.reshape(num_tiles, b_tile * HP0, LANES)

    weight_args = (kp["conv_w"], kp["conv_b"], kp["ds_w"], kp["ds_b"], kp["sel"],
                   kp["usum"], kp["head_p"], kp["head_b"], kp["m0"], kp["m1"])

    out = pl.pallas_call(
        functools.partial(_network_kernel, dn_shift=kp["dn_shift"]),
        grid=(num_tiles,),                              # >= 2 programs -> both v7x TCs busy
        in_specs=[pl.BlockSpec((1, b_tile * HP0, LANES), lambda i: (i, 0, 0))]
                 + [pl.BlockSpec(a.shape, lambda i, _nd=a.ndim: (0,) * _nd)
                    for a in weight_args],
        out_specs=pl.BlockSpec((1, b_tile, LANES), lambda i: (i, 0, 0)),
        out_shape=jax.ShapeDtypeStruct((num_tiles, b_tile, LANES), jnp.float32),
        compiler_params=pltpu.CompilerParams(dimension_semantics=("parallel",)),
        cost_estimate=pl.CostEstimate(flops=int(1.3e8) * num_tiles, transcendentals=0,
                                      bytes_accessed=int(2e6)),
    )(x, *weight_args)
    logits = out.reshape(n_pad, LANES)[:n, :NUM_CLASSES]
    return dict(outputs=logits)


# --------------------------- pure-JAX reference (f32) ---------------------------
def reference_forward(raw, images_nchw):
    scale = 1.0 / math.sqrt(1.0 + BN_EPS)                  # synthetic BN fold
    relu = jax.nn.relu

    def conv(x, w, stride, pad):
        return lax.conv_general_dilated(
            x, w * scale, (stride, stride), ((pad, pad), (pad, pad)),
            dimension_numbers=("NHWC", "HWIO", "NHWC"))

    x = jnp.transpose(images_nchw, (0, 2, 3, 1))
    feat = relu(conv(x, raw["stem_w"], 1, 1))
    for bi in range(2):                                    # layer 0
        w1, w2 = raw["blocks"][0][bi]
        identity = feat
        h = relu(conv(feat, w1, 1, 1))
        feat = relu(conv(h, w2, 1, 1) + identity)
    w1, w2 = raw["blocks"][1][0]                           # layer 1, block 0
    identity = conv(feat, raw["ds1_w"], 2, 0)
    h = relu(conv(feat, w1, 2, 1))
    feat = relu(conv(h, w2, 1, 1) + identity)
    w1, w2 = raw["blocks"][1][1]                           # layer 1, block 1
    identity = feat
    h = relu(conv(feat, w1, 1, 1))
    feat = relu(conv(h, w2, 1, 1) + identity)
    pooled = feat.mean(axis=(1, 2))
    return pooled @ raw["head_w"] + raw["head_b"]


# -------------------------------------- main -------------------------------------
if __name__ == "__main__":
    key = jax.random.PRNGKey(0)
    pkey, xkey = jax.random.split(key)
    raw = init_raw_params(pkey)
    kparams = prepare_kernel_params(raw, B_TILE)
    images = jax.random.normal(xkey, (N_BATCH, IN_CH, IMG, IMG), jnp.float32)

    fwd = jax.jit(functools.partial(single_task_network_forward, kparams))
    out = fwd(images)
    logits = jax.block_until_ready(out["outputs"])

    assert logits.shape == (N_BATCH, NUM_CLASSES)
    assert bool(jnp.all(jnp.isfinite(logits)))

    ref = reference_forward(raw, images)
    assert bool(jnp.allclose(logits, ref, rtol=2e-1, atol=2e-1)), (
        "Pallas kernel deviates from the pure-JAX reference")
    print("KERNEL_OK")
</pallas_src>

<mosaic_0001>
module attributes {stable_mosaic.version = 11 : i64} {
  func.func @k(%arg0: memref<8x128xf32, #tpu.memory_space<vmem>>, %arg1: memref<8x128xf32, #tpu.memory_space<vmem>>) attributes {dimension_semantics = [], scalar_prefetch = 0 : i64, scratch_operands = 0 : i64, tpu.core_type = #tpu.core_type<tc>} {
    %c0 = arith.constant 0 : index
    %c0_0 = arith.constant 0 : index
    %0 = vector.load %arg0[%c0, %c0_0] : memref<8x128xf32, #tpu.memory_space<vmem>>, vector<8x128xf32>
    %c1_i32 = arith.constant 1 : i32
    %1 = tpu.dynamic_rotate %0 by %c1_i32 dim 0 : vector<8x128xf32>, i32 -> vector<8x128xf32>
    %c0_1 = arith.constant 0 : index
    %c0_2 = arith.constant 0 : index
    %2 = vector.load %arg1[%c0_1, %c0_2] : memref<8x128xf32, #tpu.memory_space<vmem>>, vector<8x128xf32>
    tpu.vector_store %arg1[%c0_1, %c0_2], %1 {strides = array<i32>} : memref<8x128xf32, #tpu.memory_space<vmem>>, vector<8x128xf32>,
    return
  }
}

</mosaic_0001>

<bundles_post_ra>
// kernel: tpu_custom_call.1
= control target key start
LH: loop header
LB: loop body
LE: loop exit
PB: predicated region body
PF: predicated region fallthrough
CT: control target
= control target key end

     0   :  { %6 = vsyncpa [#allocation3], 0  ;;  %s125_s0 = inlined_call_operand.hbm [shape: f32[8,128], index: 0, kind: input, shape index: {}]   ;;  %s126_s1 = inlined_call_operand.hbm [shape: f32[8,128], index: 1, kind: output, shape index: {}]  }
   0x1   :  { %7 = vsyncpa [#allocation4], 0  ;;  %s89_s6 = smov [#allocation2]   ;;  %s41_s10 = scalar_lea.hbm %s125_s0, 128 }
   0x2   :  { %s14_s7 = sshll.u32 %s89_s6, 4  ;;  %p42_p0 = scmp.ne.s32.totalorder %s125_s0, %s41_s10  ;;  %s15_s7 = int_to_ptr.vmem [resolvable:$true] %s14_s7 }
   0x3   :  { %p45_p1 = scmp.lt.u32.totalorder %s41_s10, %s125_s0 }
   0x5   :  { %p47_p2 = pnand %p45_p1, %p42_p0 }
   0x7   :  { %50 = shalt.err (!%p47_p2)
}
   0x8   :  { %s51_s15 = scalar_lea.vmem %s15_s7, 128  ;;  %p56_p4 = scmp.lt.s32.totalorder %s15_s7, %s15_s7 }
   0x9   :  { %p52_p3 = scmp.ne.s32.totalorder %s15_s7, %s51_s15  ;;  %p57_p5 = scmp.lt.s32.totalorder %s51_s15, %s51_s15 }
   0xb   :  { %p58_p6 = por %p57_p5, %p56_p4 }
   0xd   :  { %p59_p7 = pnand %p58_p6, %p52_p3 }
   0xf   :  { %62 = shalt.err (!%p59_p7)
}
  0x10   :  { %17 = dma.hbm_to_vmem [thread:$0]  %s125_s0, 128, %s15_s7, [#allocation3]  }
  0x11   :  { %85 = dma.done.wait [#allocation3], 128  }
  0x12   :  { %86 = vsyncadd [#allocation3], 4294967168  ;;  %s90_s18 = smov [#allocation5]   ;;  %v21_v0 = vld [vmem:[#allocation2] sm:$0xff] }
  0x13   :  { %s30_s19 = sshll.u32 %s90_s18, 4  ;;  %v22_v1 = vrot.slane %v21_v0, 7  ;;  %s31_s19 = int_to_ptr.vmem [resolvable:$true] %s30_s19 }
  0x14   :  { %s63_s20 = scalar_lea.vmem %s31_s19, 128  ;;  %p68_p9 = scmp.lt.s32.totalorder %s31_s19, %s31_s19 }
  0x15   :  { %23 = vst [vmem:[#allocation5] sm:$0xff] %v22_v1  ;;  %p64_p8 = scmp.ne.s32.totalorder %s31_s19, %s63_s20  ;;  %p69_p10 = scmp.lt.s32.totalorder %s63_s20, %s63_s20 }
  0x17   :  { %p70_p11 = por %p69_p10, %p68_p9 }
  0x19   :  { %p71_p12 = pnand %p70_p11, %p64_p8 }
  0x1b   :  { %74 = shalt.err (!%p71_p12)
}
  0x1c   :  { %s75_s23 = scalar_lea.hbm %s126_s1, 128 }
  0x1d   :  { %p76_p13 = scmp.ne.s32.totalorder %s126_s1, %s75_s23  ;;  %p79_p0 = scmp.lt.u32.totalorder %s75_s23, %s126_s1 }
  0x1f   :  { %p81_p1 = pnand %p79_p0, %p76_p13 }
  0x21   :  { %84 = shalt.err (!%p81_p1)
}
  0x22   :  { %33 = dma.vmem_to_hbm [thread:$0]  %s31_s19, 128, %s126_s1, [#allocation4]  }
  0x23   :  { %87 = dma.done.wait [#allocation4], 128  }
  0x24   :  { %88 = vsyncadd [#allocation4], 4294967168 }
  0x25   :  { %37 = vsyncpa [#allocation3], 1 }
  0x26   :  { %38 = vsyncpa [#allocation4], 1 }

</bundles_post_ra>
